<compile_context>
chip_gen: v7x
topology: tpu7x:2x2x1
jax: 0.10.0
libtpu: 0.0.40
codegen_flags: <defaults>
</compile_context>

<pallas_src>
import functools
import math

import jax
import jax.numpy as jnp
from jax.experimental import pallas as pl
from jax.experimental.pallas import tpu as pltpu

LN_EPS = 1e-5  # PyTorch nn.LayerNorm default


def _round_up(n, m):
    return ((n + m - 1) // m) * m


def _vmem_capacity_bytes():
    """Per-core VMEM capacity; conservative fallback if the query fails."""
    try:
        cap = getattr(pltpu.get_tpu_info(), "vmem_capacity_bytes", None)
        if cap:
            return int(cap)
    except Exception:
        pass
    return 64 << 20  # v7x per-TensorCore VMEM (most restrictive generation)


def _padded_layernorm(h, gamma, beta, true_dim):
    """LayerNorm over the last axis of a zero-padded tile, mask-free.

    Padded columns of `h` are exactly 0 (inputs, weights, biases are all
    zero-padded), so the mean needs no mask and the sum of squares only needs
    an analytic correction of (d_pad - true_dim) * mu^2.  gamma/beta are
    zero-padded, so padded output columns come out exactly 0.
    """
    d_pad = h.shape[-1]
    inv_n = 1.0 / float(true_dim)
    mu = jnp.sum(h, axis=-1, keepdims=True) * inv_n
    centered = h - mu
    ss = jnp.sum(centered * centered, axis=-1, keepdims=True)
    if d_pad != true_dim:
        ss = ss - float(d_pad - true_dim) * mu * mu
    var = ss * inv_n
    return centered * jax.lax.rsqrt(var + LN_EPS) * gamma + beta


def projection_head_kernel(x_ref, w1_ref, b1_ref, g1_ref, be1_ref,
                           w2_ref, b2_ref, g2_ref, be2_ref, o_ref,
                           *, hidden_true, out_true):
    # --- Linear(input_dim -> hidden_dim): bf16 operands on the MXU, f32 accumulate
    x = x_ref[...].astype(jnp.bfloat16)  # no-op if already bf16
    h = jnp.dot(x, w1_ref[...], preferred_element_type=jnp.float32)
    h = h + b1_ref[...]

    # --- LayerNorm(hidden_dim) (f32, mask-free on zero-padded columns)
    h = _padded_layernorm(h, g1_ref[...], be1_ref[...], hidden_true)

    # --- GELU (tanh approximation: one EUP tanh instead of a long erf VALU chain)
    h = jax.nn.gelu(h, approximate=True)

    # --- Dropout(p=0.1): identity in eval mode.
    # TODO(synk): training-mode dropout (pltpu.prng_seed + stateful_bernoulli) not wired in.

    # --- Linear(hidden_dim -> output_dim): bf16 operands on the MXU, f32 accumulate
    y = jnp.dot(h.astype(jnp.bfloat16), w2_ref[...],
                preferred_element_type=jnp.float32)
    y = y + b2_ref[...]

    # --- LayerNorm(output_dim)
    y = _padded_layernorm(y, g2_ref[...], be2_ref[...], out_true)

    o_ref[...] = y.astype(o_ref.dtype)


def pack_params(params):
    """Pad feature dims to 128-lane multiples and cast matmul operands to bf16.

    Done ONCE (outside the per-call jitted forward) so the parameters are not
    re-padded / re-cast through HBM on every call.
    Returns (packed_param_tuple, (input_dim, hidden_dim, output_dim)).
    """
    w1, b1, g1, be1, w2, b2, g2, be2 = params
    d_in, hidden = w1.shape
    d_out = w2.shape[1]
    d_in_p, hid_p, d_out_p = (_round_up(d, 128) for d in (d_in, hidden, d_out))

    def pad2(a, r, c):
        return jnp.pad(a, ((0, r - a.shape[0]), (0, c - a.shape[1])))

    packed = (
        pad2(w1, d_in_p, hid_p).astype(jnp.bfloat16),
        pad2(b1, 1, hid_p),
        pad2(g1, 1, hid_p),
        pad2(be1, 1, hid_p),
        pad2(w2, hid_p, d_out_p).astype(jnp.bfloat16),
        pad2(b2, 1, d_out_p),
        pad2(g2, 1, d_out_p),
        pad2(be2, 1, d_out_p),
    )
    return packed, (d_in, hidden, d_out)


def _estimate_vmem_bytes(block_rows, d_in_p, hid_p, d_out_p, x_bytes):
    return (
        2 * block_rows * d_in_p * x_bytes            # x tiles (double-buffered)
        + 2 * block_rows * d_out_p * 4               # out tiles (f32, double-buffered)
        + (d_in_p * hid_p + hid_p * d_out_p) * 2     # weights (bf16, single buffer)
        + 3 * (hid_p + d_out_p) * 4                  # bias / LN params (f32)
        + block_rows * hid_p * (4 + 2)               # h intermediate (f32) + bf16 copy
        + block_rows * d_out_p * 4                   # y intermediate (f32)
    )


@functools.partial(jax.jit, static_argnames=("dims", "block_rows"))
def projection_head(x, packed, dims, block_rows=256):
    """x: [B, input_dim] f32 -> [B, output_dim] f32 (eval-mode forward).

    `packed`/`dims` come from pack_params() (padded, bf16 matmul operands).
    """
    w1_p, b1_p, g1_p, be1_p, w2_p, b2_p, g2_p, be2_p = packed
    d_in, hidden, d_out = dims
    B = x.shape[0]
    d_in_p, hid_p = w1_p.shape
    d_out_p = w2_p.shape[1]

    vmem_cap = _vmem_capacity_bytes()

    # --- Batch tiling (all static Python arithmetic on shapes) ---------------
    # Auto-bump to 512-row tiles for large batches when the VMEM budget allows
    # (mainly helps v5e/v6e; v7x's 64 MiB budget usually keeps this at 256).
    if B >= 2 * block_rows and block_rows < 512:
        if (_estimate_vmem_bytes(512, d_in_p, hid_p, d_out_p, 2) * 1.25 + (4 << 20)
                <= vmem_cap - (16 << 20)):
            block_rows = 512
    # Round to multiples of 16 (bf16 packs 16 rows per vreg sublane group);
    # never force grid >= 2 — on 1-TC chips that is pure per-step overhead.
    block_rows = max(16, min(_round_up(block_rows, 16), _round_up(B, 16)))
    # Shrink if the fully-resident-weight budget would not fit (v7x safety net).
    while (block_rows > 16 and
           _estimate_vmem_bytes(block_rows, d_in_p, hid_p, d_out_p, 4) * 1.25
           + (4 << 20) > vmem_cap - (8 << 20)):
        block_rows = max(16, _round_up(block_rows // 2, 16))
    # TODO(synk): K-tiled fallback (grid axis over d_in/hidden + f32 accumulator
    # scratch) for hidden dims whose resident weights exceed the v7x VMEM budget.

    B_p = _round_up(B, block_rows)
    grid = (B_p // block_rows,)

    # x handling: only pad when necessary; otherwise stream raw f32 and cast
    # in-kernel (halves x HBM traffic — biggest win on v5e).
    if B_p != B or d_in_p != d_in:
        x_in = jnp.pad(x, ((0, B_p - B), (0, d_in_p - d_in))).astype(jnp.bfloat16)
        x_bytes = 2
    else:
        x_in = x
        x_bytes = x.dtype.itemsize

    bytes_needed = _estimate_vmem_bytes(block_rows, d_in_p, hid_p, d_out_p, x_bytes)
    vmem_limit = int(min(max(bytes_needed * 1.25 + (4 << 20), 32 << 20),
                         vmem_cap - (8 << 20)))

    # Parameters are resident across every grid step (constant index_map), so a
    # single buffer is enough — halves their VMEM footprint (matters on v7x).
    def resident(shape):
        return pl.BlockSpec(shape, lambda i: (0,) * len(shape),
                            pipeline_mode=pl.Buffered(1))

    kernel = functools.partial(projection_head_kernel,
                               hidden_true=hidden, out_true=d_out)

    out_p = pl.pallas_call(
        kernel,
        out_shape=jax.ShapeDtypeStruct((B_p, d_out_p), jnp.float32),
        grid_spec=pltpu.PrefetchScalarGridSpec(
            num_scalar_prefetch=0,
            grid=grid,
            in_specs=[
                pl.BlockSpec((block_rows, d_in_p), lambda i: (i, 0)),  # x tile
                resident((d_in_p, hid_p)),    # w1
                resident((1, hid_p)),         # b1
                resident((1, hid_p)),         # ln1 gamma
                resident((1, hid_p)),         # ln1 beta
                resident((hid_p, d_out_p)),   # w2
                resident((1, d_out_p)),       # b2
                resident((1, d_out_p)),       # ln2 gamma
                resident((1, d_out_p)),       # ln2 beta
            ],
            out_specs=pl.BlockSpec((block_rows, d_out_p), lambda i: (i, 0)),
        ),
        compiler_params=pltpu.CompilerParams(
            dimension_semantics=("parallel",),
            vmem_limit_bytes=vmem_limit,
        ),
    )(x_in, w1_p, b1_p, g1_p, be1_p, w2_p, b2_p, g2_p, be2_p)

    return out_p[:B, :d_out]


def init_params(key, input_dim, output_dim, hidden_dim=None):
    """PyTorch-default init: U(-1/sqrt(fan_in), 1/sqrt(fan_in)) for Linear,
    ones/zeros for LayerNorm. Weights stored as [in, out]."""
    if hidden_dim is None:
        hidden_dim = input_dim
    k1, k2, k3, k4 = jax.random.split(key, 4)
    lim1 = 1.0 / math.sqrt(input_dim)
    lim2 = 1.0 / math.sqrt(hidden_dim)
    w1 = jax.random.uniform(k1, (input_dim, hidden_dim), jnp.float32, -lim1, lim1)
    b1 = jax.random.uniform(k2, (1, hidden_dim), jnp.float32, -lim1, lim1)
    g1 = jnp.ones((1, hidden_dim), jnp.float32)
    be1 = jnp.zeros((1, hidden_dim), jnp.float32)
    w2 = jax.random.uniform(k3, (hidden_dim, output_dim), jnp.float32, -lim2, lim2)
    b2 = jax.random.uniform(k4, (1, output_dim), jnp.float32, -lim2, lim2)
    g2 = jnp.ones((1, output_dim), jnp.float32)
    be2 = jnp.zeros((1, output_dim), jnp.float32)
    return (w1, b1, g1, be1, w2, b2, g2, be2)


def _layernorm_ref(h, gamma, beta):
    mu = jnp.mean(h, axis=-1, keepdims=True)
    var = jnp.mean((h - mu) * (h - mu), axis=-1, keepdims=True)
    return (h - mu) * jax.lax.rsqrt(var + LN_EPS) * gamma + beta


def _reference(x, params):
    """Pure-JAX f32 reference (eval mode, exact-erf GELU like nn.GELU())."""
    w1, b1, g1, be1, w2, b2, g2, be2 = params
    h = x @ w1 + b1
    h = _layernorm_ref(h, g1, be1)
    h = 0.5 * h * (1.0 + jax.lax.erf(h / math.sqrt(2.0)))
    y = h @ w2 + b2
    return _layernorm_ref(y, g2, be2)


if __name__ == "__main__":
    key = jax.random.PRNGKey(0)
    kx, kp = jax.random.split(key)

    # Small shapes chosen to exercise padding (non-multiples of 128 / tile rows):
    # batch=40, input_dim=96 (hidden defaults to 96), output_dim=80.
    batch, input_dim, output_dim = 40, 96, 80
    x = jax.random.normal(kx, (batch, input_dim), jnp.float32)
    params = init_params(kp, input_dim, output_dim)

    # Pad + bf16-cast the parameters ONCE, outside the per-call forward.
    packed, dims = pack_params(params)
    packed = jax.block_until_ready(packed)

    out = projection_head(x, packed, dims)
    out = jax.block_until_ready(out)

    ref = _reference(x, params)
    assert out.shape == (batch, output_dim)
    # bf16 matmul operands + tanh-approx GELU vs f32/erf reference -> ~1e-2-level deviation.
    assert jnp.allclose(out, ref, atol=5e-2, rtol=5e-2), "mismatch vs reference"

    print("KERNEL_OK")
</pallas_src>

<mosaic_0001>
module attributes {stable_mosaic.version = 11 : i64} {
  func.func @projection_head_kernel(%arg0: i32, %arg1: memref<48x128xbf16, #tpu.memory_space<vmem>>, %arg2: memref<128x128xbf16, #tpu.memory_space<vmem>>, %arg3: memref<1x128xf32, #tpu.memory_space<vmem>>, %arg4: memref<1x128xf32, #tpu.memory_space<vmem>>, %arg5: memref<1x128xf32, #tpu.memory_space<vmem>>, %arg6: memref<128x128xbf16, #tpu.memory_space<vmem>>, %arg7: memref<1x128xf32, #tpu.memory_space<vmem>>, %arg8: memref<1x128xf32, #tpu.memory_space<vmem>>, %arg9: memref<1x128xf32, #tpu.memory_space<vmem>>, %arg10: memref<48x128xf32, #tpu.memory_space<vmem>>) attributes {dimension_semantics = [#tpu.dimension_semantics<parallel>], iteration_bounds = array<i64: 1>, scalar_prefetch = 0 : i64, scratch_operands = 0 : i64, tpu.core_type = #tpu.core_type<tc>, window_params = [{transform_indices = @transform_0, window_bounds = array<i64: 48, 128>}, {pipeline_mode = #tpu.pipeline_mode<synchronous>, transform_indices = @transform_1, window_bounds = array<i64: 128, 128>}, {pipeline_mode = #tpu.pipeline_mode<synchronous>, transform_indices = @transform_2, window_bounds = array<i64: 1, 128>}, {pipeline_mode = #tpu.pipeline_mode<synchronous>, transform_indices = @transform_3, window_bounds = array<i64: 1, 128>}, {pipeline_mode = #tpu.pipeline_mode<synchronous>, transform_indices = @transform_4, window_bounds = array<i64: 1, 128>}, {pipeline_mode = #tpu.pipeline_mode<synchronous>, transform_indices = @transform_5, window_bounds = array<i64: 128, 128>}, {pipeline_mode = #tpu.pipeline_mode<synchronous>, transform_indices = @transform_6, window_bounds = array<i64: 1, 128>}, {pipeline_mode = #tpu.pipeline_mode<synchronous>, transform_indices = @transform_7, window_bounds = array<i64: 1, 128>}, {pipeline_mode = #tpu.pipeline_mode<synchronous>, transform_indices = @transform_8, window_bounds = array<i64: 1, 128>}, {transform_indices = @transform_9, window_bounds = array<i64: 48, 128>}]} {
    %c0 = arith.constant 0 : index
    %c0_0 = arith.constant 0 : index
    %0 = vector.load %arg1[%c0, %c0_0] : memref<48x128xbf16, #tpu.memory_space<vmem>>, vector<48x128xbf16>
    %c0_1 = arith.constant 0 : index
    %c0_2 = arith.constant 0 : index
    %1 = vector.load %arg2[%c0_1, %c0_2] : memref<128x128xbf16, #tpu.memory_space<vmem>>, vector<128x128xbf16>
    %cst = arith.constant dense<0.000000e+00> : vector<48x128xf32>
    %2 = tpu.matmul %0, %1, %cst {dimension_numbers = #tpu.dot_dimension_numbers<[1], [0], [0], [1], [0, 0, 1, 1], [], []>} : vector<48x128xbf16>, vector<128x128xbf16>, vector<48x128xf32> -> vector<48x128xf32>
    %c0_3 = arith.constant 0 : index
    %c0_4 = arith.constant 0 : index
    %3 = vector.load %arg3[%c0_3, %c0_4] : memref<1x128xf32, #tpu.memory_space<vmem>>, vector<1x128xf32>
    %4 = vector.broadcast %3 : vector<1x128xf32> to vector<48x128xf32>
    %5 = arith.addf %2, %4 : vector<48x128xf32>
    %c0_5 = arith.constant 0 : index
    %c0_6 = arith.constant 0 : index
    %6 = vector.load %arg4[%c0_5, %c0_6] : memref<1x128xf32, #tpu.memory_space<vmem>>, vector<1x128xf32>
    %c0_7 = arith.constant 0 : index
    %c0_8 = arith.constant 0 : index
    %7 = vector.load %arg5[%c0_7, %c0_8] : memref<1x128xf32, #tpu.memory_space<vmem>>, vector<1x128xf32>
    %cst_9 = arith.constant dense<0.000000e+00> : vector<48xf32>
    %8 = vector.multi_reduction <add>, %5, %cst_9 [1] : vector<48x128xf32> to vector<48xf32>
    %9 = vector.shape_cast %8 : vector<48xf32> to vector<48x1xf32>
    %cst_10 = arith.constant 0.010416667 : f32
    %10 = vector.broadcast %cst_10 : f32 to vector<48x1xf32>
    %11 = arith.mulf %9, %10 : vector<48x1xf32>
    %12 = vector.broadcast %11 : vector<48x1xf32> to vector<48x128xf32>
    %13 = arith.subf %5, %12 : vector<48x128xf32>
    %14 = arith.mulf %13, %13 : vector<48x128xf32>
    %cst_11 = arith.constant dense<0.000000e+00> : vector<48xf32>
    %15 = vector.multi_reduction <add>, %14, %cst_11 [1] : vector<48x128xf32> to vector<48xf32>
    %16 = vector.shape_cast %15 : vector<48xf32> to vector<48x1xf32>
    %cst_12 = arith.constant 3.200000e+01 : f32
    %17 = vector.broadcast %cst_12 : f32 to vector<48x1xf32>
    %18 = arith.mulf %17, %11 : vector<48x1xf32>
    %19 = arith.mulf %18, %11 : vector<48x1xf32>
    %20 = arith.subf %16, %19 : vector<48x1xf32>
    %cst_13 = arith.constant 0.010416667 : f32
    %21 = vector.broadcast %cst_13 : f32 to vector<48x1xf32>
    %22 = arith.mulf %20, %21 : vector<48x1xf32>
    %cst_14 = arith.constant 9.99999974E-6 : f32
    %23 = vector.broadcast %cst_14 : f32 to vector<48x1xf32>
    %24 = arith.addf %22, %23 : vector<48x1xf32>
    %25 = math.rsqrt %24 : vector<48x1xf32>
    %26 = vector.broadcast %25 : vector<48x1xf32> to vector<48x128xf32>
    %27 = arith.mulf %13, %26 : vector<48x128xf32>
    %28 = vector.broadcast %6 : vector<1x128xf32> to vector<48x128xf32>
    %29 = arith.mulf %27, %28 : vector<48x128xf32>
    %30 = vector.broadcast %7 : vector<1x128xf32> to vector<48x128xf32>
    %31 = arith.addf %29, %30 : vector<48x128xf32>
    %32 = arith.mulf %31, %31 : vector<48x128xf32>
    %33 = arith.mulf %31, %32 : vector<48x128xf32>
    %cst_15 = arith.constant 4.471500e-02 : f32
    %34 = vector.broadcast %cst_15 : f32 to vector<48x128xf32>
    %35 = arith.mulf %34, %33 : vector<48x128xf32>
    %36 = arith.addf %31, %35 : vector<48x128xf32>
    %cst_16 = arith.constant 0.797884583 : f32
    %37 = vector.broadcast %cst_16 : f32 to vector<48x128xf32>
    %38 = arith.mulf %37, %36 : vector<48x128xf32>
    %39 = math.tanh %38 : vector<48x128xf32>
    %cst_17 = arith.constant 1.000000e+00 : f32
    %40 = vector.broadcast %cst_17 : f32 to vector<48x128xf32>
    %41 = arith.addf %40, %39 : vector<48x128xf32>
    %cst_18 = arith.constant 5.000000e-01 : f32
    %42 = vector.broadcast %cst_18 : f32 to vector<48x128xf32>
    %43 = arith.mulf %42, %41 : vector<48x128xf32>
    %44 = arith.mulf %31, %43 : vector<48x128xf32>
    %45 = arith.truncf %44 : vector<48x128xf32> to vector<48x128xbf16>
    %c0_19 = arith.constant 0 : index
    %c0_20 = arith.constant 0 : index
    %46 = vector.load %arg6[%c0_19, %c0_20] : memref<128x128xbf16, #tpu.memory_space<vmem>>, vector<128x128xbf16>
    %cst_21 = arith.constant dense<0.000000e+00> : vector<48x128xf32>
    %47 = tpu.matmul %45, %46, %cst_21 {dimension_numbers = #tpu.dot_dimension_numbers<[1], [0], [0], [1], [0, 0, 1, 1], [], []>} : vector<48x128xbf16>, vector<128x128xbf16>, vector<48x128xf32> -> vector<48x128xf32>
    %c0_22 = arith.constant 0 : index
    %c0_23 = arith.constant 0 : index
    %48 = vector.load %arg7[%c0_22, %c0_23] : memref<1x128xf32, #tpu.memory_space<vmem>>, vector<1x128xf32>
    %49 = vector.broadcast %48 : vector<1x128xf32> to vector<48x128xf32>
    %50 = arith.addf %47, %49 : vector<48x128xf32>
    %c0_24 = arith.constant 0 : index
    %c0_25 = arith.constant 0 : index
    %51 = vector.load %arg8[%c0_24, %c0_25] : memref<1x128xf32, #tpu.memory_space<vmem>>, vector<1x128xf32>
    %c0_26 = arith.constant 0 : index
    %c0_27 = arith.constant 0 : index
    %52 = vector.load %arg9[%c0_26, %c0_27] : memref<1x128xf32, #tpu.memory_space<vmem>>, vector<1x128xf32>
    %cst_28 = arith.constant dense<0.000000e+00> : vector<48xf32>
    %53 = vector.multi_reduction <add>, %50, %cst_28 [1] : vector<48x128xf32> to vector<48xf32>
    %54 = vector.shape_cast %53 : vector<48xf32> to vector<48x1xf32>
    %cst_29 = arith.constant 1.250000e-02 : f32
    %55 = vector.broadcast %cst_29 : f32 to vector<48x1xf32>
    %56 = arith.mulf %54, %55 : vector<48x1xf32>
    %57 = vector.broadcast %56 : vector<48x1xf32> to vector<48x128xf32>
    %58 = arith.subf %50, %57 : vector<48x128xf32>
    %59 = arith.mulf %58, %58 : vector<48x128xf32>
    %cst_30 = arith.constant dense<0.000000e+00> : vector<48xf32>
    %60 = vector.multi_reduction <add>, %59, %cst_30 [1] : vector<48x128xf32> to vector<48xf32>
    %61 = vector.shape_cast %60 : vector<48xf32> to vector<48x1xf32>
    %cst_31 = arith.constant 4.800000e+01 : f32
    %62 = vector.broadcast %cst_31 : f32 to vector<48x1xf32>
    %63 = arith.mulf %62, %56 : vector<48x1xf32>
    %64 = arith.mulf %63, %56 : vector<48x1xf32>
    %65 = arith.subf %61, %64 : vector<48x1xf32>
    %cst_32 = arith.constant 1.250000e-02 : f32
    %66 = vector.broadcast %cst_32 : f32 to vector<48x1xf32>
    %67 = arith.mulf %65, %66 : vector<48x1xf32>
    %cst_33 = arith.constant 9.99999974E-6 : f32
    %68 = vector.broadcast %cst_33 : f32 to vector<48x1xf32>
    %69 = arith.addf %67, %68 : vector<48x1xf32>
    %70 = math.rsqrt %69 : vector<48x1xf32>
    %71 = vector.broadcast %70 : vector<48x1xf32> to vector<48x128xf32>
    %72 = arith.mulf %58, %71 : vector<48x128xf32>
    %73 = vector.broadcast %51 : vector<1x128xf32> to vector<48x128xf32>
    %74 = arith.mulf %72, %73 : vector<48x128xf32>
    %75 = vector.broadcast %52 : vector<1x128xf32> to vector<48x128xf32>
    %76 = arith.addf %74, %75 : vector<48x128xf32>
    %c0_34 = arith.constant 0 : index
    %c0_35 = arith.constant 0 : index
    %77 = vector.load %arg10[%c0_34, %c0_35] : memref<48x128xf32, #tpu.memory_space<vmem>>, vector<48x128xf32>
    tpu.vector_store %arg10[%c0_34, %c0_35], %76 {strides = array<i32>} : memref<48x128xf32, #tpu.memory_space<vmem>>, vector<48x128xf32>,
    return
  }
  func.func @transform_0(%arg0: i32) -> (i32, i32) {
    %c0_i32 = arith.constant 0 : i32
    %c0_i32_0 = arith.constant 0 : i32
    return %arg0, %c0_i32 : i32, i32
  }
  func.func @transform_1(%arg0: i32) -> (i32, i32) {
    %c0_i32 = arith.constant 0 : i32
    %c0_i32_0 = arith.constant 0 : i32
    %c0_i32_1 = arith.constant 0 : i32
    return %c0_i32, %c0_i32_0 : i32, i32
  }
  func.func @transform_2(%arg0: i32) -> (i32, i32) {
    %c0_i32 = arith.constant 0 : i32
    %c0_i32_0 = arith.constant 0 : i32
    %c0_i32_1 = arith.constant 0 : i32
    return %c0_i32, %c0_i32_0 : i32, i32
  }
  func.func @transform_3(%arg0: i32) -> (i32, i32) {
    %c0_i32 = arith.constant 0 : i32
    %c0_i32_0 = arith.constant 0 : i32
    %c0_i32_1 = arith.constant 0 : i32
    return %c0_i32, %c0_i32_0 : i32, i32
  }
  func.func @transform_4(%arg0: i32) -> (i32, i32) {
    %c0_i32 = arith.constant 0 : i32
    %c0_i32_0 = arith.constant 0 : i32
    %c0_i32_1 = arith.constant 0 : i32
    return %c0_i32, %c0_i32_0 : i32, i32
  }
  func.func @transform_5(%arg0: i32) -> (i32, i32) {
    %c0_i32 = arith.constant 0 : i32
    %c0_i32_0 = arith.constant 0 : i32
    %c0_i32_1 = arith.constant 0 : i32
    return %c0_i32, %c0_i32_0 : i32, i32
  }
  func.func @transform_6(%arg0: i32) -> (i32, i32) {
    %c0_i32 = arith.constant 0 : i32
    %c0_i32_0 = arith.constant 0 : i32
    %c0_i32_1 = arith.constant 0 : i32
    return %c0_i32, %c0_i32_0 : i32, i32
  }
  func.func @transform_7(%arg0: i32) -> (i32, i32) {
    %c0_i32 = arith.constant 0 : i32
    %c0_i32_0 = arith.constant 0 : i32
    %c0_i32_1 = arith.constant 0 : i32
    return %c0_i32, %c0_i32_0 : i32, i32
  }
  func.func @transform_8(%arg0: i32) -> (i32, i32) {
    %c0_i32 = arith.constant 0 : i32
    %c0_i32_0 = arith.constant 0 : i32
    %c0_i32_1 = arith.constant 0 : i32
    return %c0_i32, %c0_i32_0 : i32, i32
  }
  func.func @transform_9(%arg0: i32) -> (i32, i32) {
    %c0_i32 = arith.constant 0 : i32
    %c0_i32_0 = arith.constant 0 : i32
    return %arg0, %c0_i32 : i32, i32
  }
}

</mosaic_0001>

<bundles_post_ra>
// kernel: projection_head.1
= control target key start
LH: loop header
LB: loop body
LE: loop exit
PB: predicated region body
PF: predicated region fallthrough
CT: control target
= control target key end

     0   :  { %14 = vsyncpa [#allocation3], 0  ;;  %s802_s30 = smov [#allocation2]   ;;  %s1033_s0 = inlined_call_operand.vmem [shape: bf16[48,128], index: 0, kind: input, shape index: {}]   ;;  %s1034_s1 = inlined_call_operand.vmem [shape: bf16[128,128], index: 1, kind: input, shape index: {}]   ;;  %s1035_s2 = inlined_call_operand.vmem [shape: f32[1,128], index: 2, kind: input, shape index: {}]   ;;  %s1036_s3 = inlined_call_operand.vmem [shape: f32[1,128], index: 3, kind: input, shape index: {}]   ;;  %s1037_s4 = inlined_call_operand.vmem [shape: f32[1,128], index: 4, kind: input, shape index: {}]   ;;  %s1038_s5 = inlined_call_operand.hbm [shape: bf16[128,128], index: 5, kind: input, shape index: {}]   ;;  %s1039_s6 = inlined_call_operand.vmem [shape: f32[1,128], index: 6, kind: input, shape index: {}]   ;;  %s1040_s7 = inlined_call_operand.vmem [shape: f32[1,128], index: 7, kind: input, shape index: {}]   ;;  %s1041_s8 = inlined_call_operand.vmem [shape: f32[1,128], index: 8, kind: input, shape index: {}]   ;;  %s1042_s9 = inlined_call_operand.vmem [shape: f32[48,128], index: 9, kind: output, shape index: {}]  }
   0x1   :  { %s30_s10 = sshll.u32 %s802_s30, 4  ;;  %s778_s13 = scalar_lea.hbm %s1038_s5, 1024  ;;  %s31_s10 = int_to_ptr.vmem [resolvable:$true] %s30_s10 }
   0x2   :  { %p779_p0 = scmp.ne.s32.totalorder %s1038_s5, %s778_s13  ;;  %p782_p1 = scmp.lt.u32.totalorder %s778_s13, %s1038_s5 }
   0x4   :  { %p784_p2 = pnand %p782_p1, %p779_p0 }
   0x6   :  { %787 = shalt.err (!%p784_p2)
}
   0x7   :  { %s788_s18 = scalar_lea.vmem %s31_s10, 1024  ;;  %p793_p4 = scmp.lt.s32.totalorder %s31_s10, %s31_s10 }
   0x8   :  { %p789_p3 = scmp.ne.s32.totalorder %s31_s10, %s788_s18  ;;  %p794_p5 = scmp.lt.s32.totalorder %s788_s18, %s788_s18 }
   0xa   :  { %p795_p6 = por %p794_p5, %p793_p4 }
   0xc   :  { %p796_p7 = pnand %p795_p6, %p789_p3 }
   0xe   :  { %799 = shalt.err (!%p796_p7)
}
   0xf   :  { %s803_s19 = smov 64   ;;  %s804_s20 = smov 4  }
  0x10   :  { %36 = dma.hbm_to_vmem [thread:$0]  %s1038_s5, 1024, %s31_s10, [#allocation3], %s803_s19, %s803_s19, %s804_s20  }
  0x11   :  { %800 = dma.done.wait [#allocation3], 1024  }
  0x12   :  { %801 = vsyncadd [#allocation3], 4294966272  ;;  %v805_v0 = vmov 0.0   ;;  %vm806_vm0 = vmmov 0   ;;  %v723_v1 = vld [vmem:[%s1034_s1] sm:$0xff]   ;;  %v724_v2 = vld [vmem:[%s1034_s1 + $0x8] sm:$0xff]  }
  0x13   :  { %662 = vmatprep.subr.bf16.mxu0 %v805_v0  ;;  %678 = vmatprep.mubr.msk.bf16.mxu0 %vm806_vm0, %v805_v0  ;;  %v725_v3 = vld [vmem:[%s1034_s1 + $0x10] sm:$0xff]   ;;  %v726_v4 = vld [vmem:[%s1034_s1 + $0x18] sm:$0xff]   ;;  %v727_v5 = vld [vmem:[%s1034_s1 + $0x20] sm:$0xff]  }
  0x14   :  { %690 = vmatprep.subr.bf16.mxu1 %v805_v0  ;;  %706 = vmatprep.mubr.msk.bf16.mxu1 %vm806_vm0, %v805_v0  ;;  %v728_v6 = vld [vmem:[%s1034_s1 + $0x28] sm:$0xff]   ;;  %v729_v7 = vld [vmem:[%s1034_s1 + $0x30] sm:$0xff]   ;;  %v730_v8 = vld [vmem:[%s1034_s1 + $0x38] sm:$0xff]  }
  0x15   :  { %663 = vmatpush3.bf16.msra.mxu0 %v723_v1  ;;  %v731_v9 = vld [vmem:[%s1033_s0] sm:$0xff]   ;;  %v732_v10 = vld [vmem:[%s1033_s0 + $0x8] sm:$0xff]   ;;  %v733_v11 = vld [vmem:[%s1033_s0 + $0x10] sm:$0xff]  }
  0x16   :  { %664 = vmatprep.subr.bf16.mxu0 %v805_v0  ;;  %v615_v12 = vld [vmem:[%s1035_s2] ss:$0 sm:$0xff]  ;;  %v735_v56 = vld [vmem:[#allocation2 + $0x8] sm:$0xff]   ;;  %v736_v57 = vld [vmem:[#allocation2 + $0x10] sm:$0xff]  }
  0x17   :  { %v734_v55 = vld [vmem:[#allocation2] sm:$0xff]   ;;  %v737_v58 = vld [vmem:[#allocation2 + $0x18] sm:$0xff]   ;;  %v739_v60 = vld [vmem:[#allocation2 + $0x28] sm:$0xff]  }
  0x18   :  { %691 = vmatpush3.bf16.msra.mxu1 %v734_v55  ;;  %v738_v59 = vld [vmem:[#allocation2 + $0x20] sm:$0xff]   ;;  %v740_v61 = vld [vmem:[#allocation2 + $0x30] sm:$0xff]   ;;  %v741_v62 = vld [vmem:[#allocation2 + $0x38] sm:$0xff]  }
  0x19   :  { %665 = vmatpush3.bf16.msra.mxu0 %v724_v2  ;;  %692 = vmatprep.subr.bf16.mxu1 %v805_v0 }
  0x1a   :  { %666 = vmatprep.subr.bf16.mxu0 %v805_v0 }
  0x1c   :  { %693 = vmatpush3.bf16.msra.mxu1 %v735_v56 }
  0x1d   :  { %667 = vmatpush3.bf16.msra.mxu0 %v725_v3  ;;  %694 = vmatprep.subr.bf16.mxu1 %v805_v0 }
  0x1e   :  { %668 = vmatprep.subr.bf16.mxu0 %v805_v0 }
  0x20   :  { %695 = vmatpush3.bf16.msra.mxu1 %v736_v57 }
  0x21   :  { %669 = vmatpush3.bf16.msra.mxu0 %v726_v4  ;;  %696 = vmatprep.subr.bf16.mxu1 %v805_v0 }
  0x22   :  { %670 = vmatprep.subr.bf16.mxu0 %v805_v0 }
  0x24   :  { %697 = vmatpush3.bf16.msra.mxu1 %v737_v58 }
  0x25   :  { %671 = vmatpush3.bf16.msra.mxu0 %v727_v5  ;;  %698 = vmatprep.subr.bf16.mxu1 %v805_v0 }
  0x26   :  { %672 = vmatprep.subr.bf16.mxu0 %v805_v0 }
  0x28   :  { %699 = vmatpush3.bf16.msra.mxu1 %v738_v59 }
  0x29   :  { %673 = vmatpush3.bf16.msra.mxu0 %v728_v6  ;;  %700 = vmatprep.subr.bf16.mxu1 %v805_v0 }
  0x2a   :  { %674 = vmatprep.subr.bf16.mxu0 %v805_v0 }
  0x2c   :  { %701 = vmatpush3.bf16.msra.mxu1 %v739_v60 }
  0x2d   :  { %675 = vmatpush3.bf16.msra.mxu0 %v729_v7  ;;  %702 = vmatprep.subr.bf16.mxu1 %v805_v0 }
  0x2e   :  { %676 = vmatprep.subr.bf16.mxu0 %v805_v0 }
  0x30   :  { %703 = vmatpush3.bf16.msra.mxu1 %v740_v61 }
  0x31   :  { %677 = vmatpush3.bf16.msra.mxu0 %v730_v8  ;;  %704 = vmatprep.subr.bf16.mxu1 %v805_v0 }
  0x34   :  { %679 = vmatmul.mubr.bf16.vlgmr.msra.gmra.mrb[0].mxu0 %v731_v9  ;;  %705 = vmatpush3.bf16.msra.mxu1 %v741_v62 }
  0x35   :  { %682 = vmatprep.mubr.msk.bf16.mxu0 %vm806_vm0, %v805_v0 }
  0x3c   :  { %683 = vmatmul.mubr.bf16.gmra.mrb[4].mxu0 %v732_v10 }
  0x3d   :  { %686 = vmatprep.mubr.msk.bf16.mxu0 %vm806_vm0, %v805_v0 }
  0x44   :  { %687 = vmatmul.mubr.bf16.gmra.mrb[8].mxu0 %v733_v11 }
 0x107   :  { %v176_v13 = vpop.f32.mrb[0].mxu0 }
 0x108   :  { %v177_v14 = vadd.f32 %v615_v12, %v176_v13  ;;  %v680_v15 = vpop.f32.mrb[1].mxu0 }
 0x109   :  { %v179_v16 = vpop.f32.mrb[2].mxu0 }
 0x10a   :  { %201 = vadd.xlane.f32.xlu0 %v177_v14  ;;  %v681_v17 = vpop.f32.mrb[3].mxu0  ;;  %v180_v18 = vadd.f32 %v615_v12, %v179_v16 }
 0x10e   :  { %203 = vadd.xlane.f32.xlu0 %v180_v18 }
 0x10f   :  { %v184_v19 = vpop.f32.mrb[4].mxu0 }
 0x110   :  { %v185_v20 = vadd.f32 %v615_v12, %v184_v19  ;;  %v684_v21 = vpop.f32.mrb[5].mxu0 }
 0x111   :  { %v187_v22 = vpop.f32.mrb[6].mxu0 }
 0x112   :  { %205 = vadd.xlane.f32.xlu1 %v185_v20  ;;  %v685_v23 = vpop.f32.mrb[7].mxu0  ;;  %v188_v24 = vadd.f32 %v615_v12, %v187_v22 }
 0x116   :  { %207 = vadd.xlane.f32.xlu1 %v188_v24 }
 0x117   :  { %v192_v25 = vpop.f32.mrb[8].mxu0 }
 0x118   :  { %v193_v26 = vadd.f32 %v615_v12, %v192_v25  ;;  %v688_v27 = vpop.f32.mrb[9].mxu0 }
 0x119   :  { %v195_v28 = vpop.f32.mrb[10].mxu0 }
 0x11a   :  { %v196_v29 = vadd.f32 %v615_v12, %v195_v28  ;;  %209 = vadd.xlane.f32.xlu0 %v193_v26  ;;  %v689_v30 = vpop.f32.mrb[11].mxu0  ;;  %v627_v28 = vld [vmem:[%s1036_s3] ss:$0 sm:$0xff] }
 0x11c   :  { %211 = vadd.xlane.f32.xlu1 %v196_v29 }
 0x197   :  { %v202_v31 = vpop.xlane.xlu0 %201 }
 0x198   :  { %v213_v32 = vmul.f32 0.010416667, %v202_v31 }
 0x19a   :  { %v922_v33 = vsub.f32 %v177_v14, %v213_v32  ;;  %v243_v63 = vmul.f32 32.0, %v213_v32 }
 0x19b   :  { %v204_v34 = vpop.xlane.xlu0 %203 }
 0x19c   :  { %v214_v35 = vmul.f32 0.010416667, %v204_v34  ;;  %v225_v36 = vmul.f32 %v922_v33, %v922_v33  ;;  %v249_v1 = vmul.f32 %v243_v63, %v213_v32 }
 0x19e   :  { %231 = vadd.xlane.f32.xlu0 %v225_v36  ;;  %v926_v37 = vsub.f32 %v180_v18, %v214_v35  ;;  %v244_v2 = vmul.f32 32.0, %v214_v35 }
 0x19f   :  { %v206_v38 = vpop.xlane.xlu1 %205 }
 0x1a0   :  { %v215_v39 = vmul.f32 0.010416667, %v206_v38  ;;  %v226_v40 = vmul.f32 %v926_v37, %v926_v37  ;;  %v250_v6 = vmul.f32 %v244_v2, %v214_v35  ;;  %v628_v38 = vld [vmem:[%s1037_s4] ss:$0 sm:$0xff] }
 0x1a2   :  { %233 = vadd.xlane.f32.xlu1 %v226_v40  ;;  %v930_v41 = vsub.f32 %v185_v20, %v215_v39  ;;  %v245_v7 = vmul.f32 32.0, %v215_v39 }
 0x1a3   :  { %v208_v42 = vpop.xlane.xlu1 %207 }
 0x1a4   :  { %v216_v43 = vmul.f32 0.010416667, %v208_v42  ;;  %v227_v44 = vmul.f32 %v930_v41, %v930_v41  ;;  %v251_v12 = vmul.f32 %v245_v7, %v215_v39 }
 0x1a6   :  { %235 = vadd.xlane.f32.xlu0 %v227_v44  ;;  %v934_v45 = vsub.f32 %v188_v24, %v216_v43  ;;  %v246_v13 = vmul.f32 32.0, %v216_v43 }
 0x1a7   :  { %v210_v46 = vpop.xlane.xlu0 %209 }
 0x1a8   :  { %v217_v47 = vmul.f32 0.010416667, %v210_v46  ;;  %v228_v48 = vmul.f32 %v934_v45, %v934_v45  ;;  %v252_v18 = vmul.f32 %v246_v13, %v216_v43 }
 0x1a9   :  { %v212_v49 = vpop.xlane.xlu1 %211 }
 0x1aa   :  { %v938_v50 = vmul.f32 0.010416667, %v212_v49  ;;  %237 = vadd.xlane.f32.xlu1 %v228_v48  ;;  %v940_v51 = vsub.f32 %v193_v26, %v217_v47  ;;  %v247_v19 = vmul.f32 32.0, %v217_v47 }
 0x1ac   :  { %v229_v52 = vmul.f32 %v940_v51, %v940_v51  ;;  %v945_v53 = vsub.f32 %v196_v29, %v938_v50  ;;  %v248_v23 = vmul.f32 32.0, %v938_v50  ;;  %v253_v25 = vmul.f32 %v247_v19, %v217_v47 }
 0x1ae   :  { %239 = vadd.xlane.f32.xlu0 %v229_v52  ;;  %v230_v54 = vmul.f32 %v945_v53, %v945_v53  ;;  %v254_v31 = vmul.f32 %v248_v23, %v938_v50 }
 0x1b0   :  { %241 = vadd.xlane.f32.xlu1 %v230_v54 }
 0x22b   :  { %v232_v3 = vpop.xlane.xlu0 %231 }
 0x22c   :  { %v255_v4 = vsub.f32 %v232_v3, %v249_v1 }
 0x22e   :  { %v261_v5 = vmul.f32 0.010416667, %v255_v4 }
 0x22f   :  { %v234_v8 = vpop.xlane.xlu1 %233 }
 0x230   :  { %v267_v9 = vadd.f32 1e-05, %v261_v5  ;;  %v256_v10 = vsub.f32 %v234_v8, %v250_v6 }
 0x232   :  { %742 = vrsqrt.f32 %v267_v9  ;;  %v262_v11 = vmul.f32 0.010416667, %v256_v10 }
 0x233   :  { %v236_v14 = vpop.xlane.xlu0 %235 }
 0x234   :  { %v268_v15 = vadd.f32 1e-05, %v262_v11  ;;  %v257_v16 = vsub.f32 %v236_v14, %v251_v12 }
 0x236   :  { %744 = vrsqrt.f32 %v268_v15  ;;  %v263_v17 = vmul.f32 0.010416667, %v257_v16 }
 0x237   :  { %v238_v20 = vpop.xlane.xlu1 %237 }
 0x238   :  { %v269_v21 = vadd.f32 1e-05, %v263_v17  ;;  %v258_v22 = vsub.f32 %v238_v20, %v252_v18 }
 0x23a   :  { %746 = vrsqrt.f32 %v269_v21  ;;  %v264_v24 = vmul.f32 0.010416667, %v258_v22 }
 0x23b   :  { %v240_v26 = vpop.xlane.xlu0 %239 }
 0x23c   :  { %v743_v27 = vpop.eup %742  ;;  %v270_v29 = vadd.f32 1e-05, %v264_v24  ;;  %v259_v30 = vsub.f32 %v240_v26, %v253_v25 }
 0x23d   :  { %v279_v32 = vmul.f32 %v743_v27, %v922_v33  ;;  %v242_v34 = vpop.xlane.xlu1 %241 }
 0x23e   :  { %748 = vrsqrt.f32 %v270_v29  ;;  %v265_v35 = vmul.f32 0.010416667, %v259_v30  ;;  %v260_v36 = vsub.f32 %v242_v34, %v254_v31 }
 0x23f   :  { %v291_v39 = vmul.f32 %v627_v28, %v279_v32 }
 0x240   :  { %v745_v40 = vpop.eup %744  ;;  %v271_v42 = vadd.f32 1e-05, %v265_v35  ;;  %v266_v43 = vmul.f32 0.010416667, %v260_v36 }
 0x241   :  { %v280_v44 = vmul.f32 %v745_v40, %v926_v37  ;;  %v966_v46 = vadd.f32 %v628_v38, %v291_v39 }
 0x242   :  { %750 = vrsqrt.f32 %v271_v42  ;;  %v272_v47 = vadd.f32 1e-05, %v266_v43 }
 0x243   :  { %v292_v48 = vmul.f32 %v627_v28, %v280_v44  ;;  %v309_v33 = vmul.f32 %v966_v46, %v966_v46 }
 0x244   :  { %v747_v49 = vpop.eup %746  ;;  %752 = vrsqrt.f32 %v272_v47 }
 0x245   :  { %v281_v50 = vmul.f32 %v747_v49, %v930_v41  ;;  %v304_v52 = vadd.f32 %v628_v38, %v292_v48  ;;  %v315_v54 = vmul.f32 %v309_v33, %v966_v46 }
 0x247   :  { %v293_v55 = vmul.f32 %v627_v28, %v281_v50  ;;  %v310_v56 = vmul.f32 %v304_v52, %v304_v52  ;;  %v321_v57 = vmul.f32 0.044715, %v315_v54 }
 0x248   :  { %v749_v58 = vpop.eup %748 }
 0x249   :  { %v282_v37 = vmul.f32 %v749_v58, %v934_v45  ;;  %v316_v59 = vmul.f32 %v310_v56, %v304_v52  ;;  %v327_v60 = vadd.f32 %v321_v57, %v966_v46  ;;  %v305_v61 = vadd.f32 %v628_v38, %v293_v55 }
 0x24b   :  { %v294_v62 = vmul.f32 %v627_v28, %v282_v37  ;;  %v322_v63 = vmul.f32 0.044715, %v316_v59  ;;  %v333_v1 = vmul.f32 0.7978846, %v327_v60  ;;  %v311_v2 = vmul.f32 %v305_v61, %v305_v61  ;;  %v629_v60 = vld [vmem:[%s1039_s6] ss:$0 sm:$0xff] }
 0x24c   :  { %v751_v3 = vpop.eup %750 }
 0x24d   :  { %v283_v41 = vmul.f32 %v751_v3, %v940_v51  ;;  %v328_v4 = vadd.f32 %v322_v63, %v304_v52  ;;  %754 = vtanh.f32 %v333_v1  ;;  %v306_v5 = vadd.f32 %v628_v38, %v294_v62 }
 0x24e   :  { %v753_v6 = vpop.eup %752  ;;  %v317_v7 = vmul.f32 %v311_v2, %v305_v61 }
 0x24f   :  { %v295_v8 = vmul.f32 %v627_v28, %v283_v41  ;;  %v284_v9 = vmul.f32 %v753_v6, %v945_v53  ;;  %v334_v45 = vmul.f32 0.7978846, %v328_v4  ;;  %v312_v10 = vmul.f32 %v306_v5, %v306_v5 }
 0x250   :  { %v323_v11 = vmul.f32 0.044715, %v317_v7 }
 0x251   :  { %v296_v12 = vmul.f32 %v627_v28, %v284_v9  ;;  %756 = vtanh.f32 %v334_v45  ;;  %v318_v13 = vmul.f32 %v312_v10, %v306_v5  ;;  %v307_v14 = vadd.f32 %v628_v38, %v295_v8 }
 0x252   :  { %v329_v15 = vadd.f32 %v323_v11, %v305_v61 }
 0x253   :  { %v324_v16 = vmul.f32 0.044715, %v318_v13  ;;  %v308_v17 = vadd.f32 %v628_v38, %v296_v12  ;;  %v313_v18 = vmul.f32 %v307_v14, %v307_v14 }
 0x254   :  { %v335_v51 = vmul.f32 0.7978846, %v329_v15 }
 0x255   :  { %v330_v19 = vadd.f32 %v324_v16, %v306_v5  ;;  %v314_v20 = vmul.f32 %v308_v17, %v308_v17  ;;  %v319_v21 = vmul.f32 %v313_v18, %v307_v14 }
 0x256   :  { %758 = vtanh.f32 %v335_v51 }
 0x257   :  { %v755_v22 = vpop.eup %754  ;;  %v336_v23 = vmul.f32 0.7978846, %v330_v19  ;;  %v320_v24 = vmul.f32 %v314_v20, %v308_v17  ;;  %v325_v53 = vmul.f32 0.044715, %v319_v21 }
 0x258   :  { %v345_v25 = vadd.f32 1.0, %v755_v22 }
 0x259   :  { %760 = vtanh.f32 %v336_v23  ;;  %v326_v26 = vmul.f32 0.044715, %v320_v24  ;;  %v331_v27 = vadd.f32 %v325_v53, %v307_v14 }
 0x25a   :  { %v351_v32 = vmul.f32 0.5, %v345_v25 }
 0x25b   :  { %v757_v28 = vpop.eup %756  ;;  %v332_v29 = vadd.f32 %v326_v26, %v308_v17  ;;  %v337_v30 = vmul.f32 0.7978846, %v331_v27 }
 0x25c   :  { %v346_v31 = vadd.f32 1.0, %v757_v28  ;;  %v357_v38 = vmul.f32 %v351_v32, %v966_v46 }
 0x25d   :  { %v338_v34 = vmul.f32 0.7978846, %v332_v29  ;;  %762 = vtanh.f32 %v337_v30 }
 0x25e   :  { %v352_v35 = vmul.f32 0.5, %v346_v31 }
 0x25f   :  { %764 = vtanh.f32 %v338_v34 }
 0x260   :  { %v759_v36 = vpop.eup %758  ;;  %v358_v39 = vmul.f32 %v352_v35, %v304_v52 }
 0x261   :  { %v347_v40 = vadd.f32 1.0, %v759_v36 }
 0x262   :  { %v363_v42 = vpack.c.bf16 %v358_v39, %v357_v38 }
 0x263   :  { %v761_v43 = vpop.eup %760  ;;  %v353_v47 = vmul.f32 0.5, %v347_v40 }
 0x264   :  { %707 = vmatmul.mubr.bf16.vlgmr.msra.gmra.mrb[0].mxu1 %v363_v42  ;;  %v348_v44 = vadd.f32 1.0, %v761_v43 }
 0x265   :  { %710 = vmatprep.mubr.msk.bf16.mxu1 %vm806_vm0, %v805_v0  ;;  %v359_v49 = vmul.f32 %v353_v47, %v305_v61 }
 0x266   :  { %v354_v48 = vmul.f32 0.5, %v348_v44 }
 0x267   :  { %v763_v33 = vpop.eup %762 }
 0x268   :  { %v360_v50 = vmul.f32 %v354_v48, %v306_v5  ;;  %v349_v54 = vadd.f32 1.0, %v763_v33 }
 0x269   :  { %v765_v55 = vpop.eup %764 }
 0x26a   :  { %v364_v56 = vpack.c.bf16 %v360_v50, %v359_v49  ;;  %v350_v57 = vadd.f32 1.0, %v765_v55  ;;  %v355_v58 = vmul.f32 0.5, %v349_v54 }
 0x26c   :  { %711 = vmatmul.mubr.bf16.gmra.mrb[4].mxu1 %v364_v56  ;;  %v356_v46 = vmul.f32 0.5, %v350_v57  ;;  %v361_v52 = vmul.f32 %v355_v58, %v307_v14 }
 0x26d   :  { %714 = vmatprep.mubr.msk.bf16.mxu1 %vm806_vm0, %v805_v0 }
 0x26e   :  { %v362_v37 = vmul.f32 %v356_v46, %v308_v17 }
 0x270   :  { %v365_v59 = vpack.c.bf16 %v362_v37, %v361_v52 }
 0x274   :  { %715 = vmatmul.mubr.bf16.gmra.mrb[8].mxu1 %v365_v59 }
 0x337   :  { %v471_v61 = vpop.f32.mrb[0].mxu1 }
 0x338   :  { %v472_v62 = vadd.f32 %v629_v60, %v471_v61  ;;  %v708_v63 = vpop.f32.mrb[1].mxu1 }
 0x339   :  { %v474_v1 = vpop.f32.mrb[2].mxu1 }
 0x33a   :  { %v475_v2 = vadd.f32 %v629_v60, %v474_v1  ;;  %496 = vadd.xlane.f32.xlu0 %v472_v62  ;;  %v709_v3 = vpop.f32.mrb[3].mxu1 }
 0x33c   :  { %498 = vadd.xlane.f32.xlu1 %v475_v2 }
 0x33f   :  { %v479_v41 = vpop.f32.mrb[4].mxu1 }
 0x340   :  { %v480_v4 = vadd.f32 %v629_v60, %v479_v41  ;;  %v712_v5 = vpop.f32.mrb[5].mxu1 }
 0x341   :  { %v482_v0 = vpop.f32.mrb[6].mxu1 }
 0x342   :  { %v483_v6 = vadd.f32 %v629_v60, %v482_v0  ;;  %500 = vadd.xlane.f32.xlu0 %v480_v4  ;;  %v713_v7 = vpop.f32.mrb[7].mxu1 }
 0x344   :  { %502 = vadd.xlane.f32.xlu1 %v483_v6 }
 0x347   :  { %v487_v8 = vpop.f32.mrb[8].mxu1 }
 0x348   :  { %v488_v9 = vadd.f32 %v629_v60, %v487_v8  ;;  %v716_v45 = vpop.f32.mrb[9].mxu1 }
 0x349   :  { %v490_v10 = vpop.f32.mrb[10].mxu1 }
 0x34a   :  { %v491_v11 = vadd.f32 %v629_v60, %v490_v10  ;;  %504 = vadd.xlane.f32.xlu0 %v488_v9  ;;  %v717_v12 = vpop.f32.mrb[11].mxu1 }
 0x34c   :  { %506 = vadd.xlane.f32.xlu1 %v491_v11 }
 0x3c7   :  { %v497_v13 = vpop.xlane.xlu0 %496 }
 0x3c8   :  { %v508_v14 = vmul.f32 0.0125, %v497_v13 }
 0x3c9   :  { %v499_v15 = vpop.xlane.xlu1 %498 }
 0x3ca   :  { %v509_v16 = vmul.f32 0.0125, %v499_v15  ;;  %v514_v17 = vsub.f32 %v472_v62, %v508_v14  ;;  %v538_v36 = vmul.f32 48.0, %v508_v14 }
 0x3cc   :  { %v520_v18 = vmul.f32 %v514_v17, %v514_v17  ;;  %v984_v51 = vsub.f32 %v475_v2, %v509_v16  ;;  %v539_v38 = vmul.f32 48.0, %v509_v16  ;;  %v544_v39 = vmul.f32 %v538_v36, %v508_v14 }
 0x3ce   :  { %526 = vadd.xlane.f32.xlu0 %v520_v18  ;;  %v521_v19 = vmul.f32 %v984_v51, %v984_v51  ;;  %v545_v43 = vmul.f32 %v539_v38, %v509_v16 }
 0x3cf   :  { %v501_v20 = vpop.xlane.xlu0 %500 }
 0x3d0   :  { %v510_v21 = vmul.f32 0.0125, %v501_v20  ;;  %528 = vadd.xlane.f32.xlu1 %v521_v19 }
 0x3d1   :  { %v503_v22 = vpop.xlane.xlu1 %502 }
 0x3d2   :  { %v511_v23 = vmul.f32 0.0125, %v503_v22  ;;  %v988_v24 = vsub.f32 %v480_v4, %v510_v21  ;;  %v540_v33 = vmul.f32 48.0, %v510_v21  ;;  %v638_v4 = vld [vmem:[%s1040_s7] ss:$0 sm:$0xff] }
 0x3d4   :  { %v522_v53 = vmul.f32 %v988_v24, %v988_v24  ;;  %v992_v25 = vsub.f32 %v483_v6, %v511_v23  ;;  %v541_v54 = vmul.f32 48.0, %v511_v23  ;;  %v546_v56 = vmul.f32 %v540_v33, %v510_v21 }
 0x3d6   :  { %530 = vadd.xlane.f32.xlu0 %v522_v53  ;;  %v523_v26 = vmul.f32 %v992_v25, %v992_v25  ;;  %v547_v46 = vmul.f32 %v541_v54, %v511_v23 }
 0x3d7   :  { %v505_v27 = vpop.xlane.xlu0 %504 }
 0x3d8   :  { %v512_v28 = vmul.f32 0.0125, %v505_v27  ;;  %532 = vadd.xlane.f32.xlu1 %v523_v26 }
 0x3d9   :  { %v507_v29 = vpop.xlane.xlu1 %506 }
 0x3da   :  { %v513_v30 = vmul.f32 0.0125, %v507_v29  ;;  %v996_v31 = vsub.f32 %v488_v9, %v512_v28  ;;  %v542_v60 = vmul.f32 48.0, %v512_v28  ;;  %v639_v9 = vld [vmem:[%s1041_s8] ss:$0 sm:$0xff] }
 0x3dc   :  { %v524_v32 = vmul.f32 %v996_v31, %v996_v31  ;;  %v1000_v34 = vsub.f32 %v491_v11, %v513_v30  ;;  %v543_v63 = vmul.f32 48.0, %v513_v30  ;;  %v548_v2 = vmul.f32 %v542_v60, %v512_v28 }
 0x3de   :  { %534 = vadd.xlane.f32.xlu0 %v524_v32  ;;  %v525_v35 = vmul.f32 %v1000_v34, %v1000_v34  ;;  %v549_v0 = vmul.f32 %v543_v63, %v513_v30 }
 0x3e0   :  { %536 = vadd.xlane.f32.xlu1 %v525_v35 }
 0x45b   :  { %v527_v40 = vpop.xlane.xlu0 %526 }
 0x45c   :  { %v550_v42 = vsub.f32 %v527_v40, %v544_v39 }
 0x45d   :  { %v529_v44 = vpop.xlane.xlu1 %528 }
 0x45e   :  { %v556_v47 = vmul.f32 0.0125, %v550_v42  ;;  %v551_v48 = vsub.f32 %v529_v44, %v545_v43 }
 0x460   :  { %v562_v49 = vadd.f32 1e-05, %v556_v47  ;;  %v557_v50 = vmul.f32 0.0125, %v551_v48 }
 0x462   :  { %766 = vrsqrt.f32 %v562_v49  ;;  %v563_v55 = vadd.f32 1e-05, %v557_v50 }
 0x463   :  { %v531_v57 = vpop.xlane.xlu0 %530 }
 0x464   :  { %768 = vrsqrt.f32 %v563_v55  ;;  %v552_v58 = vsub.f32 %v531_v57, %v546_v56 }
 0x465   :  { %v533_v52 = vpop.xlane.xlu1 %532 }
 0x466   :  { %v558_v37 = vmul.f32 0.0125, %v552_v58  ;;  %v553_v59 = vsub.f32 %v533_v52, %v547_v46 }
 0x468   :  { %v564_v61 = vadd.f32 1e-05, %v558_v37  ;;  %v559_v62 = vmul.f32 0.0125, %v553_v59 }
 0x46a   :  { %770 = vrsqrt.f32 %v564_v61  ;;  %v565_v1 = vadd.f32 1e-05, %v559_v62 }
 0x46b   :  { %v535_v3 = vpop.xlane.xlu0 %534 }
 0x46c   :  { %v767_v41 = vpop.eup %766  ;;  %772 = vrsqrt.f32 %v565_v1  ;;  %v554_v5 = vsub.f32 %v535_v3, %v548_v2 }
 0x46d   :  { %v574_v6 = vmul.f32 %v767_v41, %v514_v17  ;;  %v537_v7 = vpop.xlane.xlu1 %536 }
 0x46e   :  { %v769_v8 = vpop.eup %768  ;;  %v560_v45 = vmul.f32 0.0125, %v554_v5  ;;  %v555_v10 = vsub.f32 %v537_v7, %v549_v0 }
 0x46f   :  { %v586_v11 = vmul.f32 %v638_v4, %v574_v6  ;;  %v575_v12 = vmul.f32 %v769_v8, %v984_v51 }
 0x470   :  { %v566_v13 = vadd.f32 1e-05, %v560_v45  ;;  %v561_v14 = vmul.f32 0.0125, %v555_v10 }
 0x471   :  { %v598_v15 = vadd.f32 %v639_v9, %v586_v11  ;;  %v587_v16 = vmul.f32 %v638_v4, %v575_v12 }
 0x472   :  { %774 = vrsqrt.f32 %v566_v13  ;;  %v567_v18 = vadd.f32 1e-05, %v561_v14 }
 0x473   :  { %604 = vst [vmem:[%s1042_s9] sm:$0xff] %v598_v15  ;;  %v599_v17 = vadd.f32 %v639_v9, %v587_v16 }
 0x474   :  { %v771_v19 = vpop.eup %770  ;;  %776 = vrsqrt.f32 %v567_v18 }
 0x475   :  { %605 = vst [vmem:[%s1042_s9 + $0x8] sm:$0xff] %v599_v17  ;;  %v576_v20 = vmul.f32 %v771_v19, %v988_v24 }
 0x476   :  { %v773_v51 = vpop.eup %772 }
 0x477   :  { %v588_v21 = vmul.f32 %v638_v4, %v576_v20  ;;  %v577_v22 = vmul.f32 %v773_v51, %v992_v25 }
 0x479   :  { %v600_v23 = vadd.f32 %v639_v9, %v588_v21  ;;  %v589_v53 = vmul.f32 %v638_v4, %v577_v22 }
 0x47b   :  { %606 = vst [vmem:[%s1042_s9 + $0x10] sm:$0xff] %v600_v23  ;;  %v601_v26 = vadd.f32 %v639_v9, %v589_v53 }
 0x47c   :  { %v775_v27 = vpop.eup %774 }
 0x47d   :  { %607 = vst [vmem:[%s1042_s9 + $0x18] sm:$0xff] %v601_v26  ;;  %v578_v28 = vmul.f32 %v775_v27, %v996_v31 }
 0x47e   :  { %v777_v29 = vpop.eup %776 }
 0x47f   :  { %v590_v24 = vmul.f32 %v638_v4, %v578_v28  ;;  %v579_v30 = vmul.f32 %v777_v29, %v1000_v34 }
 0x481   :  { %v602_v32 = vadd.f32 %v639_v9, %v590_v24  ;;  %v591_v25 = vmul.f32 %v638_v4, %v579_v30 }
 0x483   :  { %608 = vst [vmem:[%s1042_s9 + $0x20] sm:$0xff] %v602_v32  ;;  %v603_v35 = vadd.f32 %v639_v9, %v591_v25 }
 0x485   :  { %609 = vst [vmem:[%s1042_s9 + $0x28] sm:$0xff] %v603_v35 }
 0x486   :  { %614 = vsyncpa [#allocation3], 1 }

</bundles_post_ra>
